<compile_context>
chip_gen: v7x
topology: tpu7x:2x2x1
jax: 0.10.0
libtpu: 0.0.40
codegen_flags: <defaults>
</compile_context>

<pallas_src>
import functools

import jax
import jax.numpy as jnp
from jax.experimental import pallas as pl
from jax.experimental.pallas import tpu as pltpu


def _skg_conv3x3_kernel(x_ref, w_ref, rc_ref, o_ref, *, H, W):
    """One grid step: Bt batch images folded into the sublane (channel) axis.

    x_ref : (1, Bt*C_in, HW)        image block, pixels on the 128-lane axis
    w_ref : (Bt*C_out, 9*Bt*C_in)   batch-block-diagonal symmetrized taps
    rc_ref: (2, HW) int32           row / col index of every flattened pixel
    o_ref : (1, Bt*C_out, HW)
    """
    HW = x_ref.shape[2]
    x = x_ref[0]                                          # (Bt*C_in, HW)

    # Boundary predicates from the tiny row/col index input (hoisted broadcasts).
    row = jnp.broadcast_to(rc_ref[0:1, :], x.shape)       # (Bt*C_in, HW) int32
    col = jnp.broadcast_to(rc_ref[1:2, :], x.shape)
    row_has_up = row >= 1            # source row r-1 inside the image
    row_has_down = row < (H - 1)     # source row r+1 inside the image
    col_has_left = col >= 1          # source col c-1 inside the image
    col_has_right = col < (W - 1)    # source col c+1 inside the image

    # Nine lane-rolled views (no halo scratch, no VMEM staging copy).  Any
    # wrapped / out-of-image source position is zeroed by the predicates.
    views = []
    for kh in range(3):
        for kw in range(3):
            dh, dw = kh - 1, kw - 1
            src_off = dh * W + dw                         # flattened source offset
            if src_off == 0:
                xs = x
            else:
                xs = pltpu.roll(x, shift=(-src_off) % HW, axis=1)
            m = None
            if dh == -1:
                m = row_has_up
            elif dh == 1:
                m = row_has_down
            if dw == -1:
                m = col_has_left if m is None else (m & col_has_left)
            elif dw == 1:
                m = col_has_right if m is None else (m & col_has_right)
            if m is not None:
                xs = jnp.where(m, xs, 0)
            views.append(xs)

    # One fused contraction (M=Bt*C_out, K=9*Bt*C_in) instead of 9 tiny dots.
    xs_all = jnp.concatenate(views, axis=0)               # (9*Bt*C_in, HW)
    acc = jnp.dot(w_ref[...], xs_all, preferred_element_type=jnp.float32)
    o_ref[0] = acc.astype(o_ref.dtype)


def _pick_batch_tile(B, C_in, C_out):
    """Largest divisor of B such that Bt*max(C_in, C_out) <= 8 sublanes."""
    cap = max(1, 8 // max(C_in, C_out))
    bt = 1
    for cand in range(1, min(B, cap) + 1):
        if B % cand == 0:
            bt = cand
    return bt


def learnable_90_skg_conv(x, weight):
    """x: (B, C_in, H, W) NCHW.  weight: (C_out, C_in, 3, 3).  stride=1, pad=1, no bias."""
    B, C_in, H, W = x.shape
    C_out = weight.shape[0]
    HW = H * W

    # ---- symmetrize the weight (tiny; plain JAX; matches the PyTorch module) ----
    part_a = weight - jnp.flip(weight, axis=3)
    part_b = jnp.flip(jnp.flip(part_a, axis=2), axis=3)
    w_sym = (part_a - part_b) * 0.5

    Bt = _pick_batch_tile(B, C_in, C_out)

    # Taps (9, C_out, C_in), expanded block-diagonally over the Bt batch images
    # folded into channels: w_big[(b,o), (t,b2,i)] = taps[t,o,i] * [b == b2].
    w_taps = jnp.transpose(w_sym, (2, 3, 0, 1)).reshape(9, C_out, C_in)
    eye = jnp.eye(Bt, dtype=w_taps.dtype)
    w_big = jnp.einsum("toi,bc->botci", w_taps, eye).reshape(Bt * C_out, 9 * Bt * C_in)

    # Row / col of every flattened pixel: a single tiny int32 operand, constant
    # across the grid (replaces the previous nine full-image f32 masks).
    idx = jnp.arange(HW, dtype=jnp.int32)
    rc = jnp.stack([idx // W, idx % W], axis=0)           # (2, HW)

    # NCHW kept native: only FREE reshapes (no HBM transpose); pixels on lanes,
    # Bt*C channels on sublanes.
    x_flat = x.reshape(B // Bt, Bt * C_in, HW)

    kernel = functools.partial(_skg_conv3x3_kernel, H=H, W=W)

    # VMEM budget from actual tile bytes (double-buffered in/out + small
    # constant operands), clamped to the 64 MiB v7x physical VMEM.
    def _pad(n, m):
        return ((n + m - 1) // m) * m

    itemsize = x.dtype.itemsize
    x_bytes = _pad(Bt * C_in, 8) * HW * itemsize
    o_bytes = _pad(Bt * C_out, 8) * HW * itemsize
    w_bytes = _pad(Bt * C_out, 8) * _pad(9 * Bt * C_in, 128) * w_big.dtype.itemsize
    rc_bytes = _pad(2, 8) * HW * 4
    est = 2 * (x_bytes + o_bytes) + 2 * (w_bytes + rc_bytes)
    vmem_limit = int(min(64 * 1024 * 1024, max(8 * 1024 * 1024, 4 * est)))

    out = pl.pallas_call(
        kernel,
        out_shape=jax.ShapeDtypeStruct((B // Bt, Bt * C_out, HW), x.dtype),
        grid_spec=pltpu.PrefetchScalarGridSpec(
            num_scalar_prefetch=0,
            grid=(B // Bt,),
            in_specs=[
                pl.BlockSpec((1, Bt * C_in, HW), lambda b: (b, 0, 0)),
                pl.BlockSpec((Bt * C_out, 9 * Bt * C_in), lambda b: (0, 0)),
                pl.BlockSpec((2, HW), lambda b: (0, 0)),
            ],
            out_specs=pl.BlockSpec((1, Bt * C_out, HW), lambda b: (b, 0, 0)),
        ),
        compiler_params=pltpu.CompilerParams(
            dimension_semantics=("parallel",),
            vmem_limit_bytes=vmem_limit,
        ),
    )(x_flat, w_big, rc)

    # (B//Bt, Bt*C_out, H*W) -> NCHW : free reshape, no transpose.
    return out.reshape(B, C_out, H, W)


if __name__ == "__main__":
    key = jax.random.PRNGKey(0)
    kx, kw = jax.random.split(key)

    B, C_in, C_out, H, W = 2, 4, 4, 16, 16
    x = jax.random.normal(kx, (B, C_in, H, W), dtype=jnp.float32)
    weight = jax.random.normal(kw, (C_out, C_in, 3, 3), dtype=jnp.float32) * (1.0 / 6.0)

    out = learnable_90_skg_conv(x, weight)
    out = jax.block_until_ready(out)

    # ---- pure-JAX reference: symmetrize + 3x3 conv, stride 1, padding 1, no bias ----
    part_a = weight - jnp.flip(weight, axis=3)
    part_b = jnp.flip(jnp.flip(part_a, axis=2), axis=3)
    w_sym = (part_a - part_b) * 0.5
    ref = jax.lax.conv_general_dilated(
        x, w_sym, window_strides=(1, 1), padding=((1, 1), (1, 1)),
        dimension_numbers=("NCHW", "OIHW", "NCHW"))

    assert out.shape == ref.shape
    assert jnp.allclose(out, ref, atol=1e-4, rtol=1e-4), "mismatch vs reference"

    print("KERNEL_OK")
</pallas_src>

<mosaic_0001>
module attributes {stable_mosaic.version = 11 : i64} {
  func.func @_skg_conv3x3_kernel(%arg0: i32, %arg1: memref<1x8x256xf32, #tpu.memory_space<vmem>>, %arg2: memref<8x72xf32, #tpu.memory_space<vmem>>, %arg3: memref<2x256xi32, #tpu.memory_space<vmem>>, %arg4: memref<1x8x256xf32, #tpu.memory_space<vmem>>) attributes {dimension_semantics = [#tpu.dimension_semantics<parallel>], iteration_bounds = array<i64: 1>, scalar_prefetch = 0 : i64, scratch_operands = 0 : i64, tpu.core_type = #tpu.core_type<tc>, window_params = [{transform_indices = @transform_0, window_bounds = array<i64: 1, 8, 256>}, {pipeline_mode = #tpu.pipeline_mode<synchronous>, transform_indices = @transform_1, window_bounds = array<i64: 8, 72>}, {pipeline_mode = #tpu.pipeline_mode<synchronous>, transform_indices = @transform_2, window_bounds = array<i64: 2, 256>}, {transform_indices = @transform_3, window_bounds = array<i64: 1, 8, 256>}]} {
    %c0 = arith.constant 0 : index
    %c0_0 = arith.constant 0 : index
    %c0_1 = arith.constant 0 : index
    %0 = vector.load %arg1[%c0, %c0_0, %c0_1] : memref<1x8x256xf32, #tpu.memory_space<vmem>>, vector<1x8x256xf32>
    %1 = vector.shape_cast %0 : vector<1x8x256xf32> to vector<8x256xf32>
    %c0_2 = arith.constant 0 : index
    %c0_3 = arith.constant 0 : index
    %2 = vector.load %arg3[%c0_2, %c0_3] : memref<2x256xi32, #tpu.memory_space<vmem>>, vector<1x256xi32>
    %3 = vector.shape_cast %2 : vector<1x256xi32> to vector<1x256xi32>
    %4 = vector.broadcast %3 : vector<1x256xi32> to vector<8x256xi32>
    %c1 = arith.constant 1 : index
    %c0_4 = arith.constant 0 : index
    %5 = vector.load %arg3[%c1, %c0_4] : memref<2x256xi32, #tpu.memory_space<vmem>>, vector<1x256xi32>
    %6 = vector.shape_cast %5 : vector<1x256xi32> to vector<1x256xi32>
    %7 = vector.broadcast %6 : vector<1x256xi32> to vector<8x256xi32>
    %c1_i32 = arith.constant 1 : i32
    %8 = vector.broadcast %c1_i32 : i32 to vector<8x256xi32>
    %9 = arith.cmpi sge, %4, %8 : vector<8x256xi32>
    %c15_i32 = arith.constant 15 : i32
    %10 = vector.broadcast %c15_i32 : i32 to vector<8x256xi32>
    %11 = arith.cmpi slt, %4, %10 : vector<8x256xi32>
    %c1_i32_5 = arith.constant 1 : i32
    %12 = vector.broadcast %c1_i32_5 : i32 to vector<8x256xi32>
    %13 = arith.cmpi sge, %7, %12 : vector<8x256xi32>
    %c15_i32_6 = arith.constant 15 : i32
    %14 = vector.broadcast %c15_i32_6 : i32 to vector<8x256xi32>
    %15 = arith.cmpi slt, %7, %14 : vector<8x256xi32>
    %c17_i32 = arith.constant 17 : i32
    %16 = tpu.dynamic_rotate %1 by %c17_i32 dim 1 : vector<8x256xf32>, i32 -> vector<8x256xf32>
    %17 = arith.andi %9, %13 : vector<8x256xi1>
    %c0_i32 = arith.constant 0 : i32
    %18 = arith.sitofp %c0_i32 : i32 to f32
    %19 = vector.broadcast %18 : f32 to vector<8x256xf32>
    %20 = arith.select %17, %16, %19 : vector<8x256xi1>, vector<8x256xf32>
    %c16_i32 = arith.constant 16 : i32
    %21 = tpu.dynamic_rotate %1 by %c16_i32 dim 1 : vector<8x256xf32>, i32 -> vector<8x256xf32>
    %c0_i32_7 = arith.constant 0 : i32
    %22 = arith.sitofp %c0_i32_7 : i32 to f32
    %23 = vector.broadcast %22 : f32 to vector<8x256xf32>
    %24 = arith.select %9, %21, %23 : vector<8x256xi1>, vector<8x256xf32>
    %c15_i32_8 = arith.constant 15 : i32
    %25 = tpu.dynamic_rotate %1 by %c15_i32_8 dim 1 : vector<8x256xf32>, i32 -> vector<8x256xf32>
    %26 = arith.andi %9, %15 : vector<8x256xi1>
    %c0_i32_9 = arith.constant 0 : i32
    %27 = arith.sitofp %c0_i32_9 : i32 to f32
    %28 = vector.broadcast %27 : f32 to vector<8x256xf32>
    %29 = arith.select %26, %25, %28 : vector<8x256xi1>, vector<8x256xf32>
    %c1_i32_10 = arith.constant 1 : i32
    %30 = tpu.dynamic_rotate %1 by %c1_i32_10 dim 1 : vector<8x256xf32>, i32 -> vector<8x256xf32>
    %c0_i32_11 = arith.constant 0 : i32
    %31 = arith.sitofp %c0_i32_11 : i32 to f32
    %32 = vector.broadcast %31 : f32 to vector<8x256xf32>
    %33 = arith.select %13, %30, %32 : vector<8x256xi1>, vector<8x256xf32>
    %c255_i32 = arith.constant 255 : i32
    %34 = tpu.dynamic_rotate %1 by %c255_i32 dim 1 : vector<8x256xf32>, i32 -> vector<8x256xf32>
    %c0_i32_12 = arith.constant 0 : i32
    %35 = arith.sitofp %c0_i32_12 : i32 to f32
    %36 = vector.broadcast %35 : f32 to vector<8x256xf32>
    %37 = arith.select %15, %34, %36 : vector<8x256xi1>, vector<8x256xf32>
    %c241_i32 = arith.constant 241 : i32
    %38 = tpu.dynamic_rotate %1 by %c241_i32 dim 1 : vector<8x256xf32>, i32 -> vector<8x256xf32>
    %39 = arith.andi %11, %13 : vector<8x256xi1>
    %c0_i32_13 = arith.constant 0 : i32
    %40 = arith.sitofp %c0_i32_13 : i32 to f32
    %41 = vector.broadcast %40 : f32 to vector<8x256xf32>
    %42 = arith.select %39, %38, %41 : vector<8x256xi1>, vector<8x256xf32>
    %c240_i32 = arith.constant 240 : i32
    %43 = tpu.dynamic_rotate %1 by %c240_i32 dim 1 : vector<8x256xf32>, i32 -> vector<8x256xf32>
    %c0_i32_14 = arith.constant 0 : i32
    %44 = arith.sitofp %c0_i32_14 : i32 to f32
    %45 = vector.broadcast %44 : f32 to vector<8x256xf32>
    %46 = arith.select %11, %43, %45 : vector<8x256xi1>, vector<8x256xf32>
    %c239_i32 = arith.constant 239 : i32
    %47 = tpu.dynamic_rotate %1 by %c239_i32 dim 1 : vector<8x256xf32>, i32 -> vector<8x256xf32>
    %48 = arith.andi %11, %15 : vector<8x256xi1>
    %c0_i32_15 = arith.constant 0 : i32
    %49 = arith.sitofp %c0_i32_15 : i32 to f32
    %50 = vector.broadcast %49 : f32 to vector<8x256xf32>
    %51 = arith.select %48, %47, %50 : vector<8x256xi1>, vector<8x256xf32>
    %52 = tpu.concatenate %20, %24, %29, %33, %1, %37, %42, %46, %51 in 0 : vector<8x256xf32>, vector<8x256xf32>, vector<8x256xf32>, vector<8x256xf32>, vector<8x256xf32>, vector<8x256xf32>, vector<8x256xf32>, vector<8x256xf32>, vector<8x256xf32> -> vector<72x256xf32>
    %c0_16 = arith.constant 0 : index
    %c0_17 = arith.constant 0 : index
    %53 = vector.load %arg2[%c0_16, %c0_17] : memref<8x72xf32, #tpu.memory_space<vmem>>, vector<8x72xf32>
    %cst = arith.constant dense<0.000000e+00> : vector<8x256xf32>
    %54 = tpu.matmul %53, %52, %cst {dimension_numbers = #tpu.dot_dimension_numbers<[1], [0], [0], [1], [0, 0, 1, 1], [], []>} : vector<8x72xf32>, vector<72x256xf32>, vector<8x256xf32> -> vector<8x256xf32>
    %c0_18 = arith.constant 0 : index
    %c0_19 = arith.constant 0 : index
    %c0_20 = arith.constant 0 : index
    %55 = vector.load %arg4[%c0_18, %c0_19, %c0_20] : memref<1x8x256xf32, #tpu.memory_space<vmem>>, vector<1x8x256xf32>
    %56 = vector.shape_cast %55 : vector<1x8x256xf32> to vector<8x256xf32>
    %57 = vector.shape_cast %54 : vector<8x256xf32> to vector<1x8x256xf32>
    tpu.vector_store %arg4[%c0_18, %c0_19, %c0_20], %57 {strides = array<i32>} : memref<1x8x256xf32, #tpu.memory_space<vmem>>, vector<1x8x256xf32>,
    return
  }
  func.func @transform_0(%arg0: i32) -> (i32, i32, i32) {
    %c0_i32 = arith.constant 0 : i32
    %c0_i32_0 = arith.constant 0 : i32
    %c0_i32_1 = arith.constant 0 : i32
    return %arg0, %c0_i32, %c0_i32_0 : i32, i32, i32
  }
  func.func @transform_1(%arg0: i32) -> (i32, i32) {
    %c0_i32 = arith.constant 0 : i32
    %c0_i32_0 = arith.constant 0 : i32
    %c0_i32_1 = arith.constant 0 : i32
    return %c0_i32, %c0_i32_0 : i32, i32
  }
  func.func @transform_2(%arg0: i32) -> (i32, i32) {
    %c0_i32 = arith.constant 0 : i32
    %c0_i32_0 = arith.constant 0 : i32
    %c0_i32_1 = arith.constant 0 : i32
    return %c0_i32, %c0_i32_0 : i32, i32
  }
  func.func @transform_3(%arg0: i32) -> (i32, i32, i32) {
    %c0_i32 = arith.constant 0 : i32
    %c0_i32_0 = arith.constant 0 : i32
    %c0_i32_1 = arith.constant 0 : i32
    return %arg0, %c0_i32, %c0_i32_0 : i32, i32, i32
  }
}

</mosaic_0001>

<bundles_post_ra>
// kernel: tpu_custom_call.1
= control target key start
LH: loop header
LB: loop body
LE: loop exit
PB: predicated region body
PF: predicated region fallthrough
CT: control target
= control target key end

     0   :  { %8 = vsyncpa [#allocation3], 0  ;;  %s609_s0 = inlined_call_operand.hbm [shape: f32[1,8,256], index: 0, kind: input, shape index: {}]   ;;  %s610_s1 = inlined_call_operand.hbm [shape: f32[8,72], index: 1, kind: input, shape index: {}]   ;;  %s611_s2 = inlined_call_operand.vmem [shape: s32[2,256], index: 2, kind: input, shape index: {}]   ;;  %s612_s3 = inlined_call_operand.hbm [shape: f32[1,8,256], index: 3, kind: output, shape index: {}]  }
   0x1   :  { %9 = vsyncpa [#allocation6], 0 }
   0x2   :  { %10 = vsyncpa [#allocation4], 0  ;;  %s406_s12 = smov [#allocation2]   ;;  %s407_s14 = smov [#allocation5]  }
   0x3   :  { %s17_s13 = sshll.u32 %s406_s12, 4  ;;  %s27_s15 = sshll.u32 %s407_s14, 4  ;;  %s18_s13 = int_to_ptr.vmem [resolvable:$true] %s17_s13  ;;  %s28_s15 = int_to_ptr.vmem [resolvable:$true] %s27_s15 }
   0x4   :  { %s334_s18 = scalar_lea.hbm %s609_s0, 256 }
   0x5   :  { %p335_p0 = scmp.ne.s32.totalorder %s609_s0, %s334_s18  ;;  %p338_p1 = scmp.lt.u32.totalorder %s334_s18, %s609_s0 }
   0x7   :  { %p340_p2 = pnand %p338_p1, %p335_p0 }
   0x9   :  { %343 = shalt.err (!%p340_p2)
}
   0xa   :  { %s344_s23 = scalar_lea.vmem %s18_s13, 256  ;;  %p349_p4 = scmp.lt.s32.totalorder %s18_s13, %s18_s13 }
   0xb   :  { %p345_p3 = scmp.ne.s32.totalorder %s18_s13, %s344_s23  ;;  %p350_p5 = scmp.lt.s32.totalorder %s344_s23, %s344_s23 }
   0xd   :  { %p351_p6 = por %p350_p5, %p349_p4 }
   0xf   :  { %p352_p7 = pnand %p351_p6, %p345_p3 }
  0x11   :  { %355 = shalt.err (!%p352_p7)
}
  0x12   :  { %20 = dma.hbm_to_vmem [thread:$0]  %s609_s0, 256, %s18_s13, [#allocation3]  }
  0x13   :  { %s356_s28 = scalar_lea.hbm %s610_s1, 128 }
  0x14   :  { %p357_p8 = scmp.ne.s32.totalorder %s610_s1, %s356_s28  ;;  %p360_p9 = scmp.lt.u32.totalorder %s356_s28, %s610_s1 }
  0x16   :  { %p362_p10 = pnand %p360_p9, %p357_p8 }
  0x18   :  { %365 = shalt.err (!%p362_p10)
}
  0x19   :  { %s366_s6 = scalar_lea.vmem %s28_s15, 128  ;;  %p371_p12 = scmp.lt.s32.totalorder %s28_s15, %s28_s15 }
  0x1a   :  { %p367_p11 = scmp.ne.s32.totalorder %s28_s15, %s366_s6  ;;  %p372_p13 = scmp.lt.s32.totalorder %s366_s6, %s366_s6 }
  0x1c   :  { %p373_p0 = por %p372_p13, %p371_p12 }
  0x1e   :  { %p374_p1 = pnand %p373_p0, %p367_p11 }
  0x20   :  { %377 = shalt.err (!%p374_p1)
}
  0x21   :  { %30 = dma.hbm_to_vmem [thread:$0]  %s610_s1, 128, %s28_s15, [#allocation6]  }
  0x22   :  { %400 = dma.done.wait [#allocation3], 256  }
  0x23   :  { %401 = vsyncadd [#allocation3], 4294967040 }
  0x24   :  { %402 = dma.done.wait [#allocation6], 128  }
  0x25   :  { %403 = vsyncadd [#allocation6], 4294967168  ;;  %v463_v0 = vld [vmem:[#allocation2] sm:$0xff]  ;;  %v465_v1 = vld [vmem:[#allocation2 + $0x8] sm:$0xff]  ;;  %s408_s8 = smov 15   ;;  %s409_s9 = smov 17   ;;  %v42_v4 = vlaneseq }
  0x26   :  { %v309_v2 = vpack.i.bf16 %v465_v1, %v463_v0  ;;  %s410_s10 = smov 1   ;;  %s411_s11 = smov 16   ;;  %v416_v3 = vmov 0.0   ;;  %v41_v7 = vld [vmem:[%s611_s2] ss:$2 sm:$0x3] }
  0x27   :  { %s412_s1 = smov 127   ;;  %s413_s12 = smov 113   ;;  %219 = vmatprep.mubr.f32.mxu0 %v416_v3  ;;  %v43_v5 = vshrl.u32 %v42_v4, 7  ;;  %v244_v8 = vld [vmem:[%s611_s2 + $0x1] ss:$2 sm:$0x3] }
  0x28   :  { %310 = vrot.lane.b32.xlu1 %v309_v2, %s408_s8  ;;  %300 = vrot.lane.b32.xlu0 %v309_v2, %s409_s9  ;;  %s414_s13 = smov 112   ;;  %s415_s14 = smov 111   ;;  %v485_v14 = vand.u32 127, %v42_v4 }
  0x29   :  { %v48_v6 = vsub.s32 1, %v43_v5  ;;  %v44_v9 = vsub.s32 0, %v43_v5  ;;  %s418_s2 = smov [#allocation7]  }
  0x2a   :  { %vm94_vm5 = vcmp.lt.s32.totalorder %v485_v14, 15  ;;  %vm74_vm6 = vcmp.lt.s32.totalorder %v485_v14, 17  ;;  %vm105_vm8 = vcmp.lt.s32.totalorder %v485_v14, 1  ;;  %vm85_vm9 = vcmp.lt.s32.totalorder %v485_v14, 16  ;;  %s234_s19 = sshll.u32 %s418_s2, 4  ;;  %s235_s19 = int_to_ptr.vmem [resolvable:$true] %s234_s19 }
  0x2b   :  { %v477_v10 = vrot.slane %v41_v7, %v48_v6  ;;  %v479_v11 = vrot.slane %v244_v8, %v48_v6  ;;  %v481_v12 = vrot.slane %v41_v7, %v44_v9  ;;  %v483_v13 = vrot.slane %v244_v8, %v44_v9  ;;  %s378_s20 = scalar_lea.vmem %s235_s19, 256  ;;  %p383_p3 = scmp.lt.s32.totalorder %s235_s19, %s235_s19 }
  0x2c   :  { %315 = vrot.lane.b32.xlu1 %v309_v2, %s410_s10  ;;  %305 = vrot.lane.b32.xlu0 %v309_v2, %s411_s11  ;;  %vm114_vm13 = vcmp.lt.s32.totalorder %v485_v14, 127  ;;  %p379_p2 = scmp.ne.s32.totalorder %s235_s19, %s378_s20  ;;  %p384_p4 = scmp.lt.s32.totalorder %s378_s20, %s378_s20 }
  0x2d   :  { %vm61_vm0 = vcmp.ge.s32.totalorder %v477_v10, 1  ;;  %vm65_vm1 = vcmp.ge.s32.totalorder %v479_v11, 1  ;;  %vm60_vm2 = vcmp.ge.s32.totalorder %v481_v12, 1  ;;  %vm64_vm3 = vcmp.ge.s32.totalorder %v483_v13, 1 }
  0x2e   :  { %vm78_vm4 = vmand %vm61_vm0, %vm65_vm1  ;;  %vm67_vm7 = vcmp.lt.s32.totalorder %v479_v11, 15  ;;  %vm66_vm11 = vcmp.lt.s32.totalorder %v483_v13, 15  ;;  %p385_p5 = por %p384_p4, %p383_p3 }
  0x2f   :  { %vm504_vm10 = vmand %vm60_vm2, %vm64_vm3 }
  0x30   :  { %320 = vrot.lane.b32.xlu0 %v309_v2, %s412_s1  ;;  %325 = vrot.lane.b32.xlu1 %v309_v2, %s413_s12  ;;  %vm511_vm12 = vmpackc.low %vm61_vm0, %vm78_vm4  ;;  %vm123_vm4 = vcmp.lt.s32.totalorder %v485_v14, 113  ;;  %p386_p6 = pnand %p385_p5, %p379_p2 }
  0x31   :  { %vm98_vm14 = vmand %vm61_vm0, %vm67_vm7 }
  0x32   :  { %vm532_vm15 = vmpackc.low %vm60_vm2, %vm504_vm10 }
  0x33   :  { %vm540_vm0 = vmand %vm60_vm2, %vm66_vm11  ;;  %vm63_vm2 = vcmp.lt.s32.totalorder %v477_v10, 15 }
  0x34   :  { %330 = vrot.lane.b32.xlu0 %v309_v2, %s414_s13  ;;  %139 = vrot.lane.b32.xlu1 %v463_v0, %s415_s14  ;;  %v150_v2 = vld [vmem:[#allocation5] sm:$0xff] }
  0x38   :  { %141 = vrot.lane.b32.xlu0 %v465_v1, %s415_s14 }
  0x9a   :  { %v311_v15 = vpop.permute.xlu1 %310  ;;  %v301_v16 = vpop.permute.xlu0 %300 }
  0x9b   :  { %v313_v17 = vunpack.i.h.bf16 %v311_v15  ;;  %v312_v18 = vunpack.i.l.bf16 %v311_v15  ;;  %v303_v19 = vunpack.i.h.bf16 %v301_v16  ;;  %v302_v20 = vunpack.i.l.bf16 %v301_v16 }
  0x9d   :  { %v95_v29 = vsel %vm94_vm5, %v312_v18, %v313_v17  ;;  %v75_v30 = vsel %vm74_vm6, %v302_v20, %v303_v19  ;;  %v76_v33 = vsel %vm74_vm6, %v303_v19, %v302_v20  ;;  %vm269_vm6 = vmpackc.low %vm65_vm1, %vm98_vm14  ;;  %v96_v45 = vsel %vm94_vm5, %v313_v17, %v312_v18 }
  0x9e   :  { %v316_v21 = vpop.permute.xlu1 %315  ;;  %v306_v22 = vpop.permute.xlu0 %305  ;;  %vm272_vm5 = vmpackc.low %vm64_vm3, %vm540_vm0  ;;  %vm143_vm0 = vcmp.lt.s32.totalorder %v485_v14, 111 }
  0x9f   :  { %v318_v24 = vunpack.i.h.bf16 %v316_v21  ;;  %v317_v25 = vunpack.i.l.bf16 %v316_v21  ;;  %v308_v26 = vunpack.i.h.bf16 %v306_v22  ;;  %v307_v27 = vunpack.i.l.bf16 %v306_v22 }
  0xa1   :  { %v106_v31 = vsel %vm105_vm8, %v317_v25, %v318_v24  ;;  %v86_v32 = vsel %vm85_vm9, %v307_v27, %v308_v26  ;;  %v87_v34 = vsel %vm85_vm9, %v308_v26, %v307_v27  ;;  %v107_v46 = vsel %vm105_vm8, %v318_v24, %v317_v25 }
  0xa2   :  { %v262_v36 = vpack.c.bf16 %v86_v32, %v75_v30  ;;  %v265_v37 = vpack.c.bf16 %v87_v34, %v76_v33  ;;  %v321_v38 = vpop.permute.xlu0 %320  ;;  %v326_v40 = vpop.permute.xlu1 %325  ;;  %v268_v47 = vpack.c.bf16 %v106_v31, %v95_v29  ;;  %vm134_vm8 = vcmp.lt.s32.totalorder %v485_v14, 112 }
  0xa3   :  { %v323_v41 = vunpack.i.h.bf16 %v321_v38  ;;  %v322_v42 = vunpack.i.l.bf16 %v321_v38  ;;  %v328_v43 = vunpack.i.h.bf16 %v326_v40  ;;  %v327_v44 = vunpack.i.l.bf16 %v326_v40 }
  0xa4   :  { %264 = vmatprep.subr.msk.bf16.mxu0 %vm511_vm12, %v262_v36  ;;  %vm417_vm9 = vmmov 1   ;;  %v271_v52 = vpack.c.bf16 %v107_v46, %v96_v45  ;;  %vm127_vm12 = vmand %vm63_vm2, %vm65_vm1 }
  0xa5   :  { %267 = vmatpush1.bf16.msk.msra.mxu0 %vm532_vm15, %v265_v37  ;;  %v116_v48 = vsel %vm114_vm13, %v323_v41, %v322_v42  ;;  %v115_v49 = vsel %vm114_vm13, %v322_v42, %v323_v41  ;;  %vm275_vm10 = vmpackc.low %vm67_vm7, %vm417_vm9  ;;  %v125_v53 = vsel %vm123_vm4, %v328_v43, %v327_v44  ;;  %vm62_vm13 = vcmp.lt.s32.totalorder %v481_v12, 15 }
  0xa6   :  { %v274_v50 = vpack.c.bf16 %v116_v48, %v465_v1  ;;  %270 = vmatprep.subr.msk.bf16.mxu0 %vm269_vm6, %v268_v47  ;;  %v331_v51 = vpop.permute.xlu0 %330  ;;  %v277_v56 = vpack.c.bf16 %v115_v49, %v463_v0  ;;  %vm278_vm14 = vmpackc.low %vm66_vm11, %vm417_vm9  ;;  %v124_v58 = vsel %vm123_vm4, %v327_v44, %v328_v43  ;;  %v140_v61 = vpop.permute.xlu1 %139 }
  0xa7   :  { %v333_v54 = vunpack.i.h.bf16 %v331_v51  ;;  %v332_v55 = vunpack.i.l.bf16 %v331_v51  ;;  %vm281_vm15 = vmpackc.low %vm63_vm2, %vm127_vm12 }
  0xa8   :  { %vm126_vm1 = vmand %vm62_vm13, %vm64_vm3 }
  0xa9   :  { %273 = vmatpush1.bf16.msk.msra.mxu0 %vm272_vm5, %v271_v52  ;;  %v136_v57 = vsel %vm134_vm8, %v333_v54, %v332_v55  ;;  %v135_v59 = vsel %vm134_vm8, %v332_v55, %v333_v54  ;;  %vm284_vm4 = vmpackc.low %vm62_vm13, %vm126_vm1  ;;  %vm151_vm5 = vcmask 588800  }
  0xaa   :  { %v280_v60 = vpack.c.bf16 %v136_v57, %v125_v53  ;;  %276 = vmatprep.subr.msk.bf16.mxu0 %vm275_vm10, %v274_v50  ;;  %v142_v62 = vpop.permute.xlu0 %141  ;;  %v283_v63 = vpack.c.bf16 %v135_v59, %v124_v58  ;;  %vm147_vm6 = vmand %vm63_vm2, %vm67_vm7 }
  0xab   :  { %v145_v0 = vsel %vm143_vm0, %v142_v62, %v140_v61  ;;  %v144_v1 = vsel %vm143_vm0, %v140_v61, %v142_v62  ;;  %vm146_vm3 = vmand %vm62_vm13, %vm66_vm11 }
  0xad   :  { %279 = vmatpush1.bf16.msk.msra.mxu0 %vm278_vm14, %v277_v56 }
  0xae   :  { %282 = vmatprep.subr.msk.bf16.mxu0 %vm281_vm15, %v280_v60 }
  0xb1   :  { %285 = vmatpush1.bf16.msk.msra.mxu0 %vm284_vm4, %v283_v63 }
  0xb2   :  { %259 = vmatprep.subr.msk.mxu0 %vm147_vm6, %v145_v0 }
  0xb5   :  { %260 = vmatpush1.msk.msra.mxu0 %vm146_vm3, %v144_v1 }
  0xb6   :  { %261 = vmatmul.mubr.msk.f32.vlgmr.msra.gmra.mrb[0].mxu0 %vm151_vm5, %v150_v2 }
 0x189   :  { %v221_v3 = vpop.f32.mrb[0].mxu0 }
 0x18a   :  { %226 = vst [vmem:[#allocation7] sm:$0xff] %v221_v3  ;;  %v223_v4 = vpop.f32.mrb[1].mxu0 }
 0x18b   :  { %227 = vst [vmem:[#allocation7 + $0x8] sm:$0xff] %v223_v4 }
 0x18c   :  { %389 = shalt.err (!%p386_p6)
}
 0x18d   :  { %s390_s23 = scalar_lea.hbm %s612_s3, 256 }
 0x18e   :  { %p391_p7 = scmp.ne.s32.totalorder %s612_s3, %s390_s23  ;;  %p394_p8 = scmp.lt.u32.totalorder %s390_s23, %s612_s3 }
 0x190   :  { %p396_p9 = pnand %p394_p8, %p391_p7 }
 0x192   :  { %399 = shalt.err (!%p396_p9)
}
 0x193   :  { %237 = dma.vmem_to_hbm [thread:$0]  %s235_s19, 256, %s612_s3, [#allocation4]  }
 0x194   :  { %404 = dma.done.wait [#allocation4], 256  }
 0x195   :  { %405 = vsyncadd [#allocation4], 4294967040 }
 0x196   :  { %241 = vsyncpa [#allocation3], 1 }
 0x197   :  { %242 = vsyncpa [#allocation6], 1 }
 0x198   :  { %243 = vsyncpa [#allocation4], 1 }

</bundles_post_ra>
